<compile_context>
chip_gen: v7x
topology: tpu7x:2x2x1
jax: 0.10.0
libtpu: 0.0.40
codegen_flags: <defaults>
</compile_context>

<pallas_src>
import functools
import math

import jax
import jax.numpy as jnp
from jax.experimental import pallas as pl
from jax.experimental.pallas import tpu as pltpu


def _mha_kernel(q_ref, k_ref, v_ref,
                wq_ref, wk_ref, wv_ref,
                bq_ref, bk_ref, bv_ref,
                wo_ref, bo_ref,
                out_ref, *, n_heads, head_dim):
    """One batch step: project Q/K/V (block-diag), per-head attention, output proj."""
    # Block-diagonal projections: a single lane-dense 128-contraction matmul each.
    # The 1/sqrt(head_dim) scale is already folded into wq_ref / bq_ref.
    qp = jnp.dot(q_ref[...], wq_ref[...],
                 preferred_element_type=jnp.float32) + bq_ref[...]   # (Sq, E)
    kp = jnp.dot(k_ref[...], wk_ref[...],
                 preferred_element_type=jnp.float32) + bk_ref[...]   # (S,  E)
    vp = jnp.dot(v_ref[...], wv_ref[...],
                 preferred_element_type=jnp.float32) + bv_ref[...]   # (S,  E)

    # Per-head attention.  n_heads is small and static, so this unrolls at trace
    # time; slices are static lane offsets (multiples of head_dim).
    head_outs = []
    for h in range(n_heads):
        lo = h * head_dim
        q_h = qp[:, lo:lo + head_dim]                                # (Sq, Dh)
        k_h = kp[:, lo:lo + head_dim]                                # (S,  Dh)
        v_h = vp[:, lo:lo + head_dim]                                # (S,  Dh)

        # scores = q_h @ k_h^T  (contract on head_dim; scale already folded in)
        s = jax.lax.dot_general(q_h, k_h, (((1,), (1,)), ((), ())),
                                preferred_element_type=jnp.float32)  # (Sq, S)

        # Softmax along keys; reciprocal goes to the EUP slot.
        s = s - jnp.max(s, axis=-1, keepdims=True)
        p = jnp.exp(s)
        denom = jnp.sum(p, axis=-1, keepdims=True)
        p = p * pl.reciprocal(denom, approx=True)

        head_outs.append(jnp.dot(p, v_h,
                                 preferred_element_type=jnp.float32))  # (Sq, Dh)

    # Lane-dense concat of all heads, then ONE 128-contraction output projection.
    concat = jnp.concatenate(head_outs, axis=-1)                      # (Sq, E)
    out = jnp.dot(concat, wo_ref[...],
                  preferred_element_type=jnp.float32) + bo_ref[...]   # (Sq, E)
    out_ref[...] = out.astype(out_ref.dtype)


def multi_head_attention(key, query, value, params, n_heads):
    """Pallas implementation of MultiHeadAttention.forward (mask=None)."""
    B, S, E = key.shape
    Sq = query.shape[1]
    assert E % n_heads == 0
    Dh = E // n_heads
    scale = 1.0 / math.sqrt(Dh)

    # Torch Linear is y = x @ W^T + b.  Build block-diagonal (E, E) weights with
    # the shared per-head (Dh, Dh) weight on each diagonal block, so the kernel
    # never touches 32-lane Dh tiles for the projections and no host-side
    # split_heads transpose is needed.  Fold the softmax scale into the Q path.
    def block_diag(w_t):                      # w_t: (Dh, Dh) already transposed
        return jnp.kron(jnp.eye(n_heads, dtype=w_t.dtype), w_t)       # (E, E)

    wq_bd = block_diag(params["wq"].T) * scale
    wk_bd = block_diag(params["wk"].T)
    wv_bd = block_diag(params["wv"].T)
    bq = (jnp.tile(params["bq"], n_heads) * scale).reshape(1, E)
    bk = jnp.tile(params["bk"], n_heads).reshape(1, E)
    bv = jnp.tile(params["bv"], n_heads).reshape(1, E)
    wo_t = params["wo"].T                                             # (E, E)
    bo = params["bo"].reshape(1, E)

    kernel = functools.partial(_mha_kernel, n_heads=n_heads, head_dim=Dh)

    grid_spec = pltpu.PrefetchScalarGridSpec(
        num_scalar_prefetch=0,
        grid=(B,),
        in_specs=[
            # q / k / v: one full (seq, E) lane-dense tile per batch step.
            pl.BlockSpec((None, Sq, E), lambda b: (b, 0, 0)),
            pl.BlockSpec((None, S, E), lambda b: (b, 0, 0)),
            pl.BlockSpec((None, S, E), lambda b: (b, 0, 0)),
            # Block-diagonal projection weights / biases (constant block index
            # across the grid -> DMA'd once, resident in VMEM).
            pl.BlockSpec((E, E), lambda b: (0, 0)),
            pl.BlockSpec((E, E), lambda b: (0, 0)),
            pl.BlockSpec((E, E), lambda b: (0, 0)),
            pl.BlockSpec((1, E), lambda b: (0, 0)),
            pl.BlockSpec((1, E), lambda b: (0, 0)),
            pl.BlockSpec((1, E), lambda b: (0, 0)),
            # Output projection weight + bias.
            pl.BlockSpec((E, E), lambda b: (0, 0)),
            pl.BlockSpec((1, E), lambda b: (0, 0)),
        ],
        out_specs=pl.BlockSpec((None, Sq, E), lambda b: (b, 0, 0)),
    )

    out = pl.pallas_call(
        kernel,
        grid_spec=grid_spec,
        out_shape=jax.ShapeDtypeStruct((B, Sq, E), query.dtype),
        compiler_params=pltpu.CompilerParams(
            # Real parallel axis (batch) so both v7x TensorCores get work.
            dimension_semantics=("parallel",),
        ),
    )(query, key, value, wq_bd, wk_bd, wv_bd, bq, bk, bv, wo_t, bo)

    return out


def reference_mha(key, query, value, params, n_heads):
    """Pure-JAX replica of the torch forward (mask=None) for correctness checking."""
    B, S, E = key.shape
    Sq = query.shape[1]
    Dh = E // n_heads
    k = key.reshape(B, S, n_heads, Dh) @ params["wk"].T + params["bk"]
    q = query.reshape(B, Sq, n_heads, Dh) @ params["wq"].T + params["bq"]
    v = value.reshape(B, S, n_heads, Dh) @ params["wv"].T + params["bv"]
    k = k.transpose(0, 2, 1, 3)
    q = q.transpose(0, 2, 1, 3)
    v = v.transpose(0, 2, 1, 3)
    dot = jnp.einsum("bhqd,bhkd->bhqk", q, k) / math.sqrt(Dh)
    p = jax.nn.softmax(dot, axis=-1)
    ctx = jnp.einsum("bhqk,bhkd->bhqd", p, v)
    concat = ctx.transpose(0, 2, 1, 3).reshape(B, Sq, E)
    return concat @ params["wo"].T + params["bo"]


if __name__ == "__main__":
    embed_dim = 128
    n_heads = 4
    head_dim = embed_dim // n_heads
    batch, seq_kv, seq_q = 2, 16, 8

    root = jax.random.PRNGKey(0)
    ks = jax.random.split(root, 11)

    def uni(k, shape, fan_in):
        bound = 1.0 / math.sqrt(fan_in)
        return jax.random.uniform(k, shape, jnp.float32, -bound, bound)

    params = {
        "wq": uni(ks[0], (head_dim, head_dim), head_dim),
        "bq": uni(ks[1], (head_dim,), head_dim),
        "wk": uni(ks[2], (head_dim, head_dim), head_dim),
        "bk": uni(ks[3], (head_dim,), head_dim),
        "wv": uni(ks[4], (head_dim, head_dim), head_dim),
        "bv": uni(ks[5], (head_dim,), head_dim),
        "wo": uni(ks[6], (embed_dim, embed_dim), embed_dim),
        "bo": uni(ks[7], (embed_dim,), embed_dim),
    }

    key_in = jax.random.normal(ks[8], (batch, seq_kv, embed_dim), jnp.float32)
    query_in = jax.random.normal(ks[9], (batch, seq_q, embed_dim), jnp.float32)
    value_in = jax.random.normal(ks[10], (batch, seq_kv, embed_dim), jnp.float32)

    mha = jax.jit(functools.partial(multi_head_attention, n_heads=n_heads))
    out = mha(key_in, query_in, value_in, params)
    out = jax.block_until_ready(out)

    ref = reference_mha(key_in, query_in, value_in, params, n_heads)
    assert out.shape == (batch, seq_q, embed_dim)
    assert jnp.allclose(out, ref, atol=2e-2, rtol=2e-2), (
        "Pallas MHA mismatch vs reference: max abs err "
        f"{jnp.max(jnp.abs(out - ref))}"
    )

    print("KERNEL_OK")
</pallas_src>

<mosaic_0001>
module attributes {stable_mosaic.version = 11 : i64} {
  func.func @_mha_kernel(%arg0: i32, %arg1: memref<1x8x128xf32, #tpu.memory_space<vmem>>, %arg2: memref<1x16x128xf32, #tpu.memory_space<vmem>>, %arg3: memref<1x16x128xf32, #tpu.memory_space<vmem>>, %arg4: memref<128x128xf32, #tpu.memory_space<vmem>>, %arg5: memref<128x128xf32, #tpu.memory_space<vmem>>, %arg6: memref<128x128xf32, #tpu.memory_space<vmem>>, %arg7: memref<1x128xf32, #tpu.memory_space<vmem>>, %arg8: memref<1x128xf32, #tpu.memory_space<vmem>>, %arg9: memref<1x128xf32, #tpu.memory_space<vmem>>, %arg10: memref<128x128xf32, #tpu.memory_space<vmem>>, %arg11: memref<1x128xf32, #tpu.memory_space<vmem>>, %arg12: memref<1x8x128xf32, #tpu.memory_space<vmem>>) attributes {dimension_semantics = [#tpu.dimension_semantics<parallel>], iteration_bounds = array<i64: 2>, scalar_prefetch = 0 : i64, scratch_operands = 0 : i64, tpu.core_type = #tpu.core_type<tc>, window_params = [{transform_indices = @transform_0, window_bounds = array<i64: 1, 8, 128>}, {transform_indices = @transform_1, window_bounds = array<i64: 1, 16, 128>}, {transform_indices = @transform_2, window_bounds = array<i64: 1, 16, 128>}, {pipeline_mode = #tpu.pipeline_mode<synchronous>, transform_indices = @transform_3, window_bounds = array<i64: 128, 128>}, {pipeline_mode = #tpu.pipeline_mode<synchronous>, transform_indices = @transform_4, window_bounds = array<i64: 128, 128>}, {pipeline_mode = #tpu.pipeline_mode<synchronous>, transform_indices = @transform_5, window_bounds = array<i64: 128, 128>}, {pipeline_mode = #tpu.pipeline_mode<synchronous>, transform_indices = @transform_6, window_bounds = array<i64: 1, 128>}, {pipeline_mode = #tpu.pipeline_mode<synchronous>, transform_indices = @transform_7, window_bounds = array<i64: 1, 128>}, {pipeline_mode = #tpu.pipeline_mode<synchronous>, transform_indices = @transform_8, window_bounds = array<i64: 1, 128>}, {pipeline_mode = #tpu.pipeline_mode<synchronous>, transform_indices = @transform_9, window_bounds = array<i64: 128, 128>}, {pipeline_mode = #tpu.pipeline_mode<synchronous>, transform_indices = @transform_10, window_bounds = array<i64: 1, 128>}, {transform_indices = @transform_11, window_bounds = array<i64: 1, 8, 128>}]} {
    %c0 = arith.constant 0 : index
    %c0_0 = arith.constant 0 : index
    %c0_1 = arith.constant 0 : index
    %0 = vector.load %arg1[%c0, %c0_0, %c0_1] : memref<1x8x128xf32, #tpu.memory_space<vmem>>, vector<1x8x128xf32>
    %1 = vector.shape_cast %0 : vector<1x8x128xf32> to vector<8x128xf32>
    %c0_2 = arith.constant 0 : index
    %c0_3 = arith.constant 0 : index
    %2 = vector.load %arg4[%c0_2, %c0_3] : memref<128x128xf32, #tpu.memory_space<vmem>>, vector<128x128xf32>
    %cst = arith.constant dense<0.000000e+00> : vector<8x128xf32>
    %3 = tpu.matmul %1, %2, %cst {dimension_numbers = #tpu.dot_dimension_numbers<[1], [0], [0], [1], [0, 0, 1, 1], [], []>} : vector<8x128xf32>, vector<128x128xf32>, vector<8x128xf32> -> vector<8x128xf32>
    %c0_4 = arith.constant 0 : index
    %c0_5 = arith.constant 0 : index
    %4 = vector.load %arg7[%c0_4, %c0_5] : memref<1x128xf32, #tpu.memory_space<vmem>>, vector<1x128xf32>
    %5 = vector.broadcast %4 : vector<1x128xf32> to vector<8x128xf32>
    %6 = arith.addf %3, %5 : vector<8x128xf32>
    %c0_6 = arith.constant 0 : index
    %c0_7 = arith.constant 0 : index
    %c0_8 = arith.constant 0 : index
    %7 = vector.load %arg2[%c0_6, %c0_7, %c0_8] : memref<1x16x128xf32, #tpu.memory_space<vmem>>, vector<1x16x128xf32>
    %8 = vector.shape_cast %7 : vector<1x16x128xf32> to vector<16x128xf32>
    %c0_9 = arith.constant 0 : index
    %c0_10 = arith.constant 0 : index
    %9 = vector.load %arg5[%c0_9, %c0_10] : memref<128x128xf32, #tpu.memory_space<vmem>>, vector<128x128xf32>
    %cst_11 = arith.constant dense<0.000000e+00> : vector<16x128xf32>
    %10 = tpu.matmul %8, %9, %cst_11 {dimension_numbers = #tpu.dot_dimension_numbers<[1], [0], [0], [1], [0, 0, 1, 1], [], []>} : vector<16x128xf32>, vector<128x128xf32>, vector<16x128xf32> -> vector<16x128xf32>
    %c0_12 = arith.constant 0 : index
    %c0_13 = arith.constant 0 : index
    %11 = vector.load %arg8[%c0_12, %c0_13] : memref<1x128xf32, #tpu.memory_space<vmem>>, vector<1x128xf32>
    %12 = vector.broadcast %11 : vector<1x128xf32> to vector<16x128xf32>
    %13 = arith.addf %10, %12 : vector<16x128xf32>
    %c0_14 = arith.constant 0 : index
    %c0_15 = arith.constant 0 : index
    %c0_16 = arith.constant 0 : index
    %14 = vector.load %arg3[%c0_14, %c0_15, %c0_16] : memref<1x16x128xf32, #tpu.memory_space<vmem>>, vector<1x16x128xf32>
    %15 = vector.shape_cast %14 : vector<1x16x128xf32> to vector<16x128xf32>
    %c0_17 = arith.constant 0 : index
    %c0_18 = arith.constant 0 : index
    %16 = vector.load %arg6[%c0_17, %c0_18] : memref<128x128xf32, #tpu.memory_space<vmem>>, vector<128x128xf32>
    %cst_19 = arith.constant dense<0.000000e+00> : vector<16x128xf32>
    %17 = tpu.matmul %15, %16, %cst_19 {dimension_numbers = #tpu.dot_dimension_numbers<[1], [0], [0], [1], [0, 0, 1, 1], [], []>} : vector<16x128xf32>, vector<128x128xf32>, vector<16x128xf32> -> vector<16x128xf32>
    %c0_20 = arith.constant 0 : index
    %c0_21 = arith.constant 0 : index
    %18 = vector.load %arg9[%c0_20, %c0_21] : memref<1x128xf32, #tpu.memory_space<vmem>>, vector<1x128xf32>
    %19 = vector.broadcast %18 : vector<1x128xf32> to vector<16x128xf32>
    %20 = arith.addf %17, %19 : vector<16x128xf32>
    %21 = vector.extract_strided_slice %6 {offsets = [0, 0], sizes = [8, 32], strides = [1, 1]} : vector<8x128xf32> to vector<8x32xf32>
    %22 = vector.extract_strided_slice %13 {offsets = [0, 0], sizes = [16, 32], strides = [1, 1]} : vector<16x128xf32> to vector<16x32xf32>
    %23 = vector.extract_strided_slice %20 {offsets = [0, 0], sizes = [16, 32], strides = [1, 1]} : vector<16x128xf32> to vector<16x32xf32>
    %cst_22 = arith.constant dense<0.000000e+00> : vector<8x16xf32>
    %24 = tpu.matmul %21, %22, %cst_22 {dimension_numbers = #tpu.dot_dimension_numbers<[1], [1], [0], [0], [0, 0, 1, 0], [], []>} : vector<8x32xf32>, vector<16x32xf32>, vector<8x16xf32> -> vector<8x16xf32>
    %cst_23 = arith.constant dense<0xFF800000> : vector<8xf32>
    %25 = vector.multi_reduction <maximumf>, %24, %cst_23 [1] : vector<8x16xf32> to vector<8xf32>
    %26 = vector.shape_cast %25 : vector<8xf32> to vector<8x1xf32>
    %27 = vector.broadcast %26 : vector<8x1xf32> to vector<8x16xf32>
    %28 = arith.subf %24, %27 : vector<8x16xf32>
    %29 = math.exp %28 : vector<8x16xf32>
    %cst_24 = arith.constant dense<0.000000e+00> : vector<8xf32>
    %30 = vector.multi_reduction <add>, %29, %cst_24 [1] : vector<8x16xf32> to vector<8xf32>
    %31 = vector.shape_cast %30 : vector<8xf32> to vector<8x1xf32>
    %32 = tpu.reciprocal %31 {approx = true} : vector<8x1xf32> -> vector<8x1xf32>
    %33 = vector.broadcast %32 : vector<8x1xf32> to vector<8x16xf32>
    %34 = arith.mulf %29, %33 : vector<8x16xf32>
    %cst_25 = arith.constant dense<0.000000e+00> : vector<8x32xf32>
    %35 = tpu.matmul %34, %23, %cst_25 {dimension_numbers = #tpu.dot_dimension_numbers<[1], [0], [0], [1], [0, 0, 1, 1], [], []>} : vector<8x16xf32>, vector<16x32xf32>, vector<8x32xf32> -> vector<8x32xf32>
    %36 = vector.extract_strided_slice %6 {offsets = [0, 32], sizes = [8, 32], strides = [1, 1]} : vector<8x128xf32> to vector<8x32xf32>
    %37 = vector.extract_strided_slice %13 {offsets = [0, 32], sizes = [16, 32], strides = [1, 1]} : vector<16x128xf32> to vector<16x32xf32>
    %38 = vector.extract_strided_slice %20 {offsets = [0, 32], sizes = [16, 32], strides = [1, 1]} : vector<16x128xf32> to vector<16x32xf32>
    %cst_26 = arith.constant dense<0.000000e+00> : vector<8x16xf32>
    %39 = tpu.matmul %36, %37, %cst_26 {dimension_numbers = #tpu.dot_dimension_numbers<[1], [1], [0], [0], [0, 0, 1, 0], [], []>} : vector<8x32xf32>, vector<16x32xf32>, vector<8x16xf32> -> vector<8x16xf32>
    %cst_27 = arith.constant dense<0xFF800000> : vector<8xf32>
    %40 = vector.multi_reduction <maximumf>, %39, %cst_27 [1] : vector<8x16xf32> to vector<8xf32>
    %41 = vector.shape_cast %40 : vector<8xf32> to vector<8x1xf32>
    %42 = vector.broadcast %41 : vector<8x1xf32> to vector<8x16xf32>
    %43 = arith.subf %39, %42 : vector<8x16xf32>
    %44 = math.exp %43 : vector<8x16xf32>
    %cst_28 = arith.constant dense<0.000000e+00> : vector<8xf32>
    %45 = vector.multi_reduction <add>, %44, %cst_28 [1] : vector<8x16xf32> to vector<8xf32>
    %46 = vector.shape_cast %45 : vector<8xf32> to vector<8x1xf32>
    %47 = tpu.reciprocal %46 {approx = true} : vector<8x1xf32> -> vector<8x1xf32>
    %48 = vector.broadcast %47 : vector<8x1xf32> to vector<8x16xf32>
    %49 = arith.mulf %44, %48 : vector<8x16xf32>
    %cst_29 = arith.constant dense<0.000000e+00> : vector<8x32xf32>
    %50 = tpu.matmul %49, %38, %cst_29 {dimension_numbers = #tpu.dot_dimension_numbers<[1], [0], [0], [1], [0, 0, 1, 1], [], []>} : vector<8x16xf32>, vector<16x32xf32>, vector<8x32xf32> -> vector<8x32xf32>
    %51 = vector.extract_strided_slice %6 {offsets = [0, 64], sizes = [8, 32], strides = [1, 1]} : vector<8x128xf32> to vector<8x32xf32>
    %52 = vector.extract_strided_slice %13 {offsets = [0, 64], sizes = [16, 32], strides = [1, 1]} : vector<16x128xf32> to vector<16x32xf32>
    %53 = vector.extract_strided_slice %20 {offsets = [0, 64], sizes = [16, 32], strides = [1, 1]} : vector<16x128xf32> to vector<16x32xf32>
    %cst_30 = arith.constant dense<0.000000e+00> : vector<8x16xf32>
    %54 = tpu.matmul %51, %52, %cst_30 {dimension_numbers = #tpu.dot_dimension_numbers<[1], [1], [0], [0], [0, 0, 1, 0], [], []>} : vector<8x32xf32>, vector<16x32xf32>, vector<8x16xf32> -> vector<8x16xf32>
    %cst_31 = arith.constant dense<0xFF800000> : vector<8xf32>
    %55 = vector.multi_reduction <maximumf>, %54, %cst_31 [1] : vector<8x16xf32> to vector<8xf32>
    %56 = vector.shape_cast %55 : vector<8xf32> to vector<8x1xf32>
    %57 = vector.broadcast %56 : vector<8x1xf32> to vector<8x16xf32>
    %58 = arith.subf %54, %57 : vector<8x16xf32>
    %59 = math.exp %58 : vector<8x16xf32>
    %cst_32 = arith.constant dense<0.000000e+00> : vector<8xf32>
    %60 = vector.multi_reduction <add>, %59, %cst_32 [1] : vector<8x16xf32> to vector<8xf32>
    %61 = vector.shape_cast %60 : vector<8xf32> to vector<8x1xf32>
    %62 = tpu.reciprocal %61 {approx = true} : vector<8x1xf32> -> vector<8x1xf32>
    %63 = vector.broadcast %62 : vector<8x1xf32> to vector<8x16xf32>
    %64 = arith.mulf %59, %63 : vector<8x16xf32>
    %cst_33 = arith.constant dense<0.000000e+00> : vector<8x32xf32>
    %65 = tpu.matmul %64, %53, %cst_33 {dimension_numbers = #tpu.dot_dimension_numbers<[1], [0], [0], [1], [0, 0, 1, 1], [], []>} : vector<8x16xf32>, vector<16x32xf32>, vector<8x32xf32> -> vector<8x32xf32>
    %66 = vector.extract_strided_slice %6 {offsets = [0, 96], sizes = [8, 32], strides = [1, 1]} : vector<8x128xf32> to vector<8x32xf32>
    %67 = vector.extract_strided_slice %13 {offsets = [0, 96], sizes = [16, 32], strides = [1, 1]} : vector<16x128xf32> to vector<16x32xf32>
    %68 = vector.extract_strided_slice %20 {offsets = [0, 96], sizes = [16, 32], strides = [1, 1]} : vector<16x128xf32> to vector<16x32xf32>
    %cst_34 = arith.constant dense<0.000000e+00> : vector<8x16xf32>
    %69 = tpu.matmul %66, %67, %cst_34 {dimension_numbers = #tpu.dot_dimension_numbers<[1], [1], [0], [0], [0, 0, 1, 0], [], []>} : vector<8x32xf32>, vector<16x32xf32>, vector<8x16xf32> -> vector<8x16xf32>
    %cst_35 = arith.constant dense<0xFF800000> : vector<8xf32>
    %70 = vector.multi_reduction <maximumf>, %69, %cst_35 [1] : vector<8x16xf32> to vector<8xf32>
    %71 = vector.shape_cast %70 : vector<8xf32> to vector<8x1xf32>
    %72 = vector.broadcast %71 : vector<8x1xf32> to vector<8x16xf32>
    %73 = arith.subf %69, %72 : vector<8x16xf32>
    %74 = math.exp %73 : vector<8x16xf32>
    %cst_36 = arith.constant dense<0.000000e+00> : vector<8xf32>
    %75 = vector.multi_reduction <add>, %74, %cst_36 [1] : vector<8x16xf32> to vector<8xf32>
    %76 = vector.shape_cast %75 : vector<8xf32> to vector<8x1xf32>
    %77 = tpu.reciprocal %76 {approx = true} : vector<8x1xf32> -> vector<8x1xf32>
    %78 = vector.broadcast %77 : vector<8x1xf32> to vector<8x16xf32>
    %79 = arith.mulf %74, %78 : vector<8x16xf32>
    %cst_37 = arith.constant dense<0.000000e+00> : vector<8x32xf32>
    %80 = tpu.matmul %79, %68, %cst_37 {dimension_numbers = #tpu.dot_dimension_numbers<[1], [0], [0], [1], [0, 0, 1, 1], [], []>} : vector<8x16xf32>, vector<16x32xf32>, vector<8x32xf32> -> vector<8x32xf32>
    %81 = tpu.concatenate %35, %50, %65, %80 in 1 : vector<8x32xf32>, vector<8x32xf32>, vector<8x32xf32>, vector<8x32xf32> -> vector<8x128xf32>
    %c0_38 = arith.constant 0 : index
    %c0_39 = arith.constant 0 : index
    %82 = vector.load %arg10[%c0_38, %c0_39] : memref<128x128xf32, #tpu.memory_space<vmem>>, vector<128x128xf32>
    %cst_40 = arith.constant dense<0.000000e+00> : vector<8x128xf32>
    %83 = tpu.matmul %81, %82, %cst_40 {dimension_numbers = #tpu.dot_dimension_numbers<[1], [0], [0], [1], [0, 0, 1, 1], [], []>} : vector<8x128xf32>, vector<128x128xf32>, vector<8x128xf32> -> vector<8x128xf32>
    %c0_41 = arith.constant 0 : index
    %c0_42 = arith.constant 0 : index
    %84 = vector.load %arg11[%c0_41, %c0_42] : memref<1x128xf32, #tpu.memory_space<vmem>>, vector<1x128xf32>
    %85 = vector.broadcast %84 : vector<1x128xf32> to vector<8x128xf32>
    %86 = arith.addf %83, %85 : vector<8x128xf32>
    %c0_43 = arith.constant 0 : index
    %c0_44 = arith.constant 0 : index
    %c0_45 = arith.constant 0 : index
    %87 = vector.load %arg12[%c0_43, %c0_44, %c0_45] : memref<1x8x128xf32, #tpu.memory_space<vmem>>, vector<1x8x128xf32>
    %88 = vector.shape_cast %87 : vector<1x8x128xf32> to vector<8x128xf32>
    %89 = vector.shape_cast %86 : vector<8x128xf32> to vector<1x8x128xf32>
    tpu.vector_store %arg12[%c0_43, %c0_44, %c0_45], %89 {strides = array<i32>} : memref<1x8x128xf32, #tpu.memory_space<vmem>>, vector<1x8x128xf32>,
    return
  }
  func.func @transform_0(%arg0: i32) -> (i32, i32, i32) {
    %c0_i32 = arith.constant 0 : i32
    %c0_i32_0 = arith.constant 0 : i32
    %c0_i32_1 = arith.constant 0 : i32
    return %arg0, %c0_i32, %c0_i32_0 : i32, i32, i32
  }
  func.func @transform_1(%arg0: i32) -> (i32, i32, i32) {
    %c0_i32 = arith.constant 0 : i32
    %c0_i32_0 = arith.constant 0 : i32
    %c0_i32_1 = arith.constant 0 : i32
    return %arg0, %c0_i32, %c0_i32_0 : i32, i32, i32
  }
  func.func @transform_2(%arg0: i32) -> (i32, i32, i32) {
    %c0_i32 = arith.constant 0 : i32
    %c0_i32_0 = arith.constant 0 : i32
    %c0_i32_1 = arith.constant 0 : i32
    return %arg0, %c0_i32, %c0_i32_0 : i32, i32, i32
  }
  func.func @transform_3(%arg0: i32) -> (i32, i32) {
    %c0_i32 = arith.constant 0 : i32
    %c0_i32_0 = arith.constant 0 : i32
    %c0_i32_1 = arith.constant 0 : i32
    return %c0_i32, %c0_i32_0 : i32, i32
  }
  func.func @transform_4(%arg0: i32) -> (i32, i32) {
    %c0_i32 = arith.constant 0 : i32
    %c0_i32_0 = arith.constant 0 : i32
    %c0_i32_1 = arith.constant 0 : i32
    return %c0_i32, %c0_i32_0 : i32, i32
  }
  func.func @transform_5(%arg0: i32) -> (i32, i32) {
    %c0_i32 = arith.constant 0 : i32
    %c0_i32_0 = arith.constant 0 : i32
    %c0_i32_1 = arith.constant 0 : i32
    return %c0_i32, %c0_i32_0 : i32, i32
  }
  func.func @transform_6(%arg0: i32) -> (i32, i32) {
    %c0_i32 = arith.constant 0 : i32
    %c0_i32_0 = arith.constant 0 : i32
    %c0_i32_1 = arith.constant 0 : i32
    return %c0_i32, %c0_i32_0 : i32, i32
  }
  func.func @transform_7(%arg0: i32) -> (i32, i32) {
    %c0_i32 = arith.constant 0 : i32
    %c0_i32_0 = arith.constant 0 : i32
    %c0_i32_1 = arith.constant 0 : i32
    return %c0_i32, %c0_i32_0 : i32, i32
  }
  func.func @transform_8(%arg0: i32) -> (i32, i32) {
    %c0_i32 = arith.constant 0 : i32
    %c0_i32_0 = arith.constant 0 : i32
    %c0_i32_1 = arith.constant 0 : i32
    return %c0_i32, %c0_i32_0 : i32, i32
  }
  func.func @transform_9(%arg0: i32) -> (i32, i32) {
    %c0_i32 = arith.constant 0 : i32
    %c0_i32_0 = arith.constant 0 : i32
    %c0_i32_1 = arith.constant 0 : i32
    return %c0_i32, %c0_i32_0 : i32, i32
  }
  func.func @transform_10(%arg0: i32) -> (i32, i32) {
    %c0_i32 = arith.constant 0 : i32
    %c0_i32_0 = arith.constant 0 : i32
    %c0_i32_1 = arith.constant 0 : i32
    return %c0_i32, %c0_i32_0 : i32, i32
  }
  func.func @transform_11(%arg0: i32) -> (i32, i32, i32) {
    %c0_i32 = arith.constant 0 : i32
    %c0_i32_0 = arith.constant 0 : i32
    %c0_i32_1 = arith.constant 0 : i32
    return %arg0, %c0_i32, %c0_i32_0 : i32, i32, i32
  }
}

</mosaic_0001>

<bundles_post_ra>
// kernel: multi_head_attention.1
= control target key start
LH: loop header
LB: loop body
LE: loop exit
PB: predicated region body
PF: predicated region fallthrough
CT: control target
= control target key end

     0   :  { %16 = vsyncpa [#allocation3], 0  ;;  %s2727_s0 = inlined_call_operand.vmem [shape: f32[2,8,128], index: 0, kind: input, shape index: {}]   ;;  %s2728_s1 = inlined_call_operand.vmem [shape: f32[2,16,128], index: 1, kind: input, shape index: {}]   ;;  %s2729_s2 = inlined_call_operand.vmem [shape: f32[2,16,128], index: 2, kind: input, shape index: {}]   ;;  %s2730_s3 = inlined_call_operand.vmem [shape: f32[128,128], index: 3, kind: input, shape index: {}]   ;;  %s2731_s4 = inlined_call_operand.vmem [shape: f32[128,128], index: 4, kind: input, shape index: {}]   ;;  %s2732_s5 = inlined_call_operand.vmem [shape: f32[128,128], index: 5, kind: input, shape index: {}]   ;;  %s2733_s6 = inlined_call_operand.vmem [shape: f32[1,128], index: 6, kind: input, shape index: {}]   ;;  %s2734_s7 = inlined_call_operand.vmem [shape: f32[1,128], index: 7, kind: input, shape index: {}]   ;;  %s2735_s8 = inlined_call_operand.vmem [shape: f32[1,128], index: 8, kind: input, shape index: {}]   ;;  %s2736_s9 = inlined_call_operand.vmem [shape: f32[128,128], index: 9, kind: input, shape index: {}]   ;;  %s2737_s10 = inlined_call_operand.vmem [shape: f32[1,128], index: 10, kind: input, shape index: {}]   ;;  %s2738_s11 = inlined_call_operand.hbm [shape: f32[2,8,128], index: 11, kind: output, shape index: {}]  }
   0x1   :  { %18 = vsyncpa [#allocation3 + $0x1], 0  ;;  %s2295_s17 = smov 0   ;;  %s2297_s18 = smov 0  }
   0x2   :  { %s2299_s19 = smov 0   ;;  %s2301_s20 = smov 0  }
   0x3 LB: > { %2742 = sst [smem:[#allocation5_spill]] %s2222_s19  ;;  %s2316_s21 = sadd.s32 4294967295, %s2226_s20   ;;  %s2226_s20 = sphi %s2301_s20, %s2753_s20   ;;  %s2222_s19 = sphi %s2299_s19, %s2750_s19   ;;  %s2218_s18 = sphi %s2297_s18, %s2752_s18   ;;  %s2214_s17 = sphi %s2295_s17, %s2751_s17  }
   0x4   : > { %s1607_s22 = sadd.s32 4294967294, %s2226_s20   ;;  %s2320_s23 = sadd.s32 1, %s2226_s20  }
   0x5   : > { %s277_s24 = sadd.s32 1, %s2222_s19  ;;  %s274_s25 = ssub.s32 %s2226_s20, %s2320_s23 }
   0x6   : > { %p287_p0 = scmp.ne.s32.totalorder %s2222_s19, %s2218_s18  ;;  %p275_p1 = scmp.eq.s32.totalorder %s274_s25, 0 }
   0x7   : > { %p288_p2 = scmp.eq.s32.totalorder %s2316_s21, 1  ;;  %p293_p3 = scmp.ne.s32.totalorder %s2218_s18, %s2214_s17 }
   0x8   : > { %p294_p4 = scmp.eq.s32.totalorder %s1607_s22, 1  ;;  %p1610_p7 = scmp.ge.s32.totalorder %s2226_s20, 1 }
   0x9   : > { %s2331_s26 = scalar_select %p275_p1, %s2222_s19, %s277_s24  }
   0xa   : > { %p2333_p5 = por %p288_p2, %p287_p0  ;;  %p2337_p6 = por %p294_p4, %p293_p3 }
   0xb   : > { %2743 = sst [smem:[#allocation6_spill]] %s2331_s26  ;;  %p359_p8 = scmp.lt.s32.totalorder %s2226_s20, 3 }
   0xd   : > { %p360_p9 = pnand %p1610_p7, %p359_p8 }
   0xe   : > { %v518_v0 = vld [vmem:[%s2731_s4] sm:$0xff] (!%p360_p9)  ;;  %v519_v1 = vld [vmem:[%s2731_s4 + $0x8] sm:$0xff] (!%p360_p9)  ;;  %v520_v2 = vld [vmem:[%s2731_s4 + $0x10] sm:$0xff] (!%p360_p9)  ;;  %p408_p10 = scmp.lt.s32.totalorder (!%p360_p9), %s2316_s21, 1  ;;  %v2228_v6 = vmov (!%p360_p9), 0.0|0.0   ;;  %vm2229_vm0 = vmmov (!%p360_p9), 0  }
   0xf   : > { %363 = sbr.rel (%p360_p9) target bundleno = 2957 (0xb8d), region = 64  ;;  %v1957_v3 = vpack.c.bf16 (!%p360_p9), %v519_v1, %v518_v0  ;;  %v521_v4 = vld [vmem:[%s2731_s4 + $0x18] sm:$0xff] (!%p360_p9)  ;;  %v522_v5 = vld [vmem:[%s2731_s4 + $0x20] sm:$0xff] (!%p360_p9)  ;;  %1933 = vmatprep.subr.bf16.mxu0 (!%p360_p9), %v2228_v6  ;;  %v523_v8 = vld [vmem:[%s2731_s4 + $0x28] sm:$0xff] (!%p360_p9)  ;;  %v2230_v11 = vmov (!%p360_p9), 0.0   ;;  %vm716_vm1 = vcmask (!%p360_p9), 261120  }
  0x10   : > { %v1961_v7 = vpack.c.bf16 (!%p360_p9), %v521_v4, %v520_v2  ;;  %v423_v9 = vld [vmem:[%s2730_s3] sm:$0xff] (!%p360_p9)  ;;  %v424_v10 = vld [vmem:[%s2730_s3 + $0x8] sm:$0xff] (!%p360_p9)  ;;  %1769 = vmatprep.mubr.msk.f32.mxu0 (!%p360_p9), %vm2229_vm0, %v2230_v11  ;;  %v425_v13 = vld [vmem:[%s2730_s3 + $0x10] sm:$0xff] (!%p360_p9)  ;;  %v1965_v15 = vpack.c.bf16 (!%p360_p9), %v523_v8, %v522_v5  ;;  %s2740_s25 = smov (!%p360_p9), 96   ;;  %vm796_vm3 = vcmask (!%p360_p9), 130048   ;;  %s2748_s15 = smov (!%p360_p9), 96  }
  0x11   : > { %1958 = vmatprep.subr.bf16.mxu1 (!%p360_p9), %v1957_v3  ;;  %v1934_v12 = vpack.c.bf16 (!%p360_p9), %v424_v10, %v423_v9  ;;  %v426_v14 = vld [vmem:[%s2730_s3 + $0x18] sm:$0xff] (!%p360_p9)  ;;  %v524_v16 = vld [vmem:[%s2731_s4 + $0x30] sm:$0xff] (!%p360_p9)  ;;  %v427_v19 = vld [vmem:[%s2730_s3 + $0x20] sm:$0xff] (!%p360_p9)  ;;  %s2232_s19 = smov (!%p360_p9), 64   ;;  %s2233_s26 = smov (!%p360_p9), 32   ;;  %vm1412_vm4 = vcmask (!%p360_p9), 523264  }
  0x12   : > { %1960 = vmatpush3.bf16.msra.mxu1 (!%p360_p9), %v1957_v3  ;;  %v1937_v17 = vpack.c.bf16 (!%p360_p9), %v426_v14, %v425_v13  ;;  %v525_v18 = vld [vmem:[%s2731_s4 + $0x38] sm:$0xff] (!%p360_p9)  ;;  %v428_v20 = vld [vmem:[%s2730_s3 + $0x28] sm:$0xff] (!%p360_p9)  ;;  %v526_v22 = vld [vmem:[%s2731_s4 + $0x40] sm:$0xff] (!%p360_p9)  ;;  %vm1414_vm5 = vcmask (!%p360_p9), 785408  }
  0x13   : > { %1962 = vmatprep.subr.bf16.mxu1 (!%p360_p9), %v1961_v7  ;;  %1935 = vmatpush3.bf16.msra.mxu0 (!%p360_p9), %v1934_v12  ;;  %v1969_v21 = vpack.c.bf16 (!%p360_p9), %v525_v18, %v524_v16  ;;  %v1940_v23 = vpack.c.bf16 (!%p360_p9), %v428_v20, %v427_v19  ;;  %v527_v25 = vld [vmem:[%s2731_s4 + $0x48] sm:$0xff] (!%p360_p9)  ;;  %v429_v26 = vld [vmem:[%s2730_s3 + $0x30] sm:$0xff] (!%p360_p9)  ;;  %v430_v27 = vld [vmem:[%s2730_s3 + $0x38] sm:$0xff] (!%p360_p9) }
  0x14   : > { %1936 = vmatprep.subr.bf16.mxu0 (!%p360_p9), %v2228_v6  ;;  %v1973_v28 = vpack.c.bf16 (!%p360_p9), %v527_v25, %v526_v22  ;;  %v528_v29 = vld [vmem:[%s2731_s4 + $0x50] sm:$0xff] (!%p360_p9)  ;;  %v1943_v30 = vpack.c.bf16 (!%p360_p9), %v430_v27, %v429_v26  ;;  %v529_v31 = vld [vmem:[%s2731_s4 + $0x58] sm:$0xff] (!%p360_p9)  ;;  %v431_v32 = vld [vmem:[%s2730_s3 + $0x40] sm:$0xff] (!%p360_p9) }
  0x15   : > { %v432_v33 = vld [vmem:[%s2730_s3 + $0x48] sm:$0xff] (!%p360_p9)  ;;  %v1977_v34 = vpack.c.bf16 (!%p360_p9), %v529_v31, %v528_v29  ;;  %v530_v35 = vld [vmem:[%s2731_s4 + $0x60] sm:$0xff] (!%p360_p9)  ;;  %v433_v38 = vld [vmem:[%s2730_s3 + $0x50] sm:$0xff] (!%p360_p9) }
  0x16   : > { %s2370_s16 = scalar_select %p408_p10, %s2316_s21, 1  ;;  %1964 = vmatpush3.bf16.msra.mxu1 %v1961_v7  ;;  %v1946_v36 = vpack.c.bf16 %v432_v33, %v431_v32  ;;  %v531_v37 = vld [vmem:[%s2731_s4 + $0x68] sm:$0xff]  ;;  %v434_v39 = vld [vmem:[%s2730_s3 + $0x58] sm:$0xff]  ;;  %v532_v41 = vld [vmem:[%s2731_s4 + $0x70] sm:$0xff] }
  0x17   : > { %1966 = vmatprep.subr.bf16.mxu1 %v1965_v15  ;;  %1938 = vmatpush3.bf16.msra.mxu0 %v1937_v17  ;;  %v1981_v40 = vpack.c.bf16 %v531_v37, %v530_v35  ;;  %v1949_v42 = vpack.c.bf16 %v434_v39, %v433_v38  ;;  %v533_v43 = vld [vmem:[%s2731_s4 + $0x78] sm:$0xff]  ;;  %v435_v44 = vld [vmem:[%s2730_s3 + $0x60] sm:$0xff]  ;;  %v436_v45 = vld [vmem:[%s2730_s3 + $0x68] sm:$0xff] }
  0x18   : > { %s1641_s30 = sshll.u32 %s2370_s16, 4  ;;  %1939 = vmatprep.subr.bf16.mxu0 %v2228_v6  ;;  %v1985_v46 = vpack.c.bf16 %v533_v43, %v532_v41  ;;  %v1952_v47 = vpack.c.bf16 %v436_v45, %v435_v44  ;;  %v437_v48 = vld [vmem:[%s2730_s3 + $0x70] sm:$0xff]  ;;  %v438_v49 = vld [vmem:[%s2730_s3 + $0x78] sm:$0xff]  ;;  %s1612_s13 = sshll.u32 %s2370_s16, 3  ;;  %v1618_v53 = vld [vmem:[%s2734_s7] ss:$0 sm:$0xff] }
  0x19   : > { %s2399_s12 = scalar_lea.vmem %s2728_s1, %s1641_s30  ;;  %v1955_v50 = vpack.c.bf16 %v438_v49, %v437_v48  ;;  %s411_s22 = scalar_lea.vmem %s2727_s0, %s1612_s13  ;;  %vm2475_vm2 = vmpackc.low %vm716_vm1, %vm716_vm1  ;;  %v1617_v61 = vld [vmem:[%s2733_s6] ss:$0 sm:$0xff]  ;;  %v619_v2 = vld [vmem:[%s2732_s5 + $0x8] sm:$0xff] }
  0x1a   : > { %v516_v24 = vld [vmem:[%s2399_s12] sm:$0xff]  ;;  %1968 = vmatpush3.bf16.msra.mxu1 %v1965_v15  ;;  %v517_v51 = vld [vmem:[%s2399_s12 + $0x8] sm:$0xff]  ;;  %v620_v3 = vld [vmem:[%s2732_s5 + $0x10] sm:$0xff] }
  0x1b   : > { %1804 = vmatprep.mubr.f32.mxu1 %v516_v24  ;;  %1970 = vmatprep.subr.bf16.mxu1 %v1969_v21  ;;  %v422_v52 = vld [vmem:[%s411_s22] sm:$0xff]  ;;  %v621_v5 = vld [vmem:[%s2732_s5 + $0x18] sm:$0xff]  ;;  %v623_v9 = vld [vmem:[%s2732_s5 + $0x28] sm:$0xff]  ;;  %s2520_s22 = scalar_lea.vmem %s2729_s2, %s1641_s30 }
  0x1c   : > { %1941 = vmatpush3.bf16.msra.mxu0 %v1940_v23  ;;  %v618_v1 = vld [vmem:[%s2732_s5] sm:$0xff]  ;;  %v1993_v7 = vpack.c.bf16 %v621_v5, %v620_v3  ;;  %v624_v13 = vld [vmem:[%s2732_s5 + $0x30] sm:$0xff]  ;;  %v625_v14 = vld [vmem:[%s2732_s5 + $0x38] sm:$0xff] }
  0x1d   : > { %1942 = vmatprep.subr.bf16.mxu0 %v2228_v6  ;;  %v1989_v4 = vpack.c.bf16 %v619_v2, %v618_v1  ;;  %v622_v8 = vld [vmem:[%s2732_s5 + $0x20] sm:$0xff]  ;;  %v2001_v15 = vpack.c.bf16 %v625_v14, %v624_v13  ;;  %v627_v17 = vld [vmem:[%s2732_s5 + $0x48] sm:$0xff]  ;;  %v628_v19 = vld [vmem:[%s2732_s5 + $0x50] sm:$0xff] }
  0x1e   : > { %1972 = vmatpush3.bf16.msra.mxu1 %v1969_v21  ;;  %v1997_v10 = vpack.c.bf16 %v623_v9, %v622_v8  ;;  %v616_v12 = vld [vmem:[%s2520_s22] sm:$0xff]  ;;  %v629_v20 = vld [vmem:[%s2732_s5 + $0x58] sm:$0xff]  ;;  %v631_v23 = vld [vmem:[%s2732_s5 + $0x68] sm:$0xff] }
  0x1f   : > { %1974 = vmatprep.subr.bf16.mxu1 %v1973_v28  ;;  %v626_v16 = vld [vmem:[%s2732_s5 + $0x40] sm:$0xff]  ;;  %v2009_v21 = vpack.c.bf16 %v629_v20, %v628_v19  ;;  %v632_v25 = vld [vmem:[%s2732_s5 + $0x70] sm:$0xff]  ;;  %v633_v26 = vld [vmem:[%s2732_s5 + $0x78] sm:$0xff] }
  0x20   : > { %1944 = vmatpush3.bf16.msra.mxu0 %v1943_v30  ;;  %v2005_v18 = vpack.c.bf16 %v627_v17, %v626_v16  ;;  %v630_v22 = vld [vmem:[%s2732_s5 + $0x60] sm:$0xff]  ;;  %v2017_v27 = vpack.c.bf16 %v633_v26, %v632_v25 }
  0x21   : > { %1945 = vmatprep.subr.bf16.mxu0 %v2228_v6  ;;  %v2013_v24 = vpack.c.bf16 %v631_v23, %v630_v22  ;;  %v1619_v39 = vld [vmem:[%s2735_s8] ss:$0 sm:$0xff] }
  0x22   : > { %1976 = vmatpush3.bf16.msra.mxu1 %v1973_v28  ;;  %v617_v28 = vld [vmem:[%s2520_s22 + $0x8] sm:$0xff] }
  0x23   : > { %1978 = vmatprep.subr.bf16.mxu1 %v1977_v34 }
  0x24   : > { %1947 = vmatpush3.bf16.msra.mxu0 %v1946_v36 }
  0x25   : > { %1948 = vmatprep.subr.bf16.mxu0 %v2228_v6 }
  0x26   : > { %1980 = vmatpush3.bf16.msra.mxu1 %v1977_v34 }
  0x27   : > { %1982 = vmatprep.subr.bf16.mxu1 %v1981_v40 }
  0x28   : > { %1950 = vmatpush3.bf16.msra.mxu0 %v1949_v42 }
  0x29   : > { %1951 = vmatprep.subr.bf16.mxu0 %v2228_v6 }
  0x2a   : > { %1984 = vmatpush3.bf16.msra.mxu1 %v1981_v40 }
  0x2b   : > { %1986 = vmatprep.subr.bf16.mxu1 %v1985_v46 }
  0x2c   : > { %1953 = vmatpush3.bf16.msra.mxu0 %v1952_v47 }
  0x2d   : > { %1954 = vmatprep.subr.bf16.mxu0 %v2228_v6 }
  0x2e   : > { %1988 = vmatpush3.bf16.msra.mxu1 %v1985_v46 }
  0x2f   : > { %2021 = vmatprep.subr.bf16.mxu1 %v2228_v6 }
  0x30   : > { %1956 = vmatpush3.bf16.msra.mxu0 %v1955_v50 }
  0x31   : > { %1805 = vmatmul.mubr.f32.vlgmr.msra.gmra.mrb[0].mxu1 %v517_v51  ;;  %1990 = vmatprep.subr.bf16.mxu0 %v1989_v4 }
  0x32   : > { %1846 = vmatprep.mubr.msk.f32.mxu1 %vm2229_vm0, %v2230_v11 }
  0x33   : > { %1770 = vmatmul.mubr.f32.vlgmr.msra.gmra.mrb[0].mxu0 %v422_v52 }
  0x34   : > { %1992 = vmatpush3.bf16.msra.mxu0 %v1989_v4  ;;  %1839 = vmatprep.mubr.f32.mxu0 %v616_v12 }
  0x35   : > { %1994 = vmatprep.subr.bf16.mxu0 %v1993_v7 }
  0x38   : > { %1996 = vmatpush3.bf16.msra.mxu0 %v1993_v7 }
  0x39   : > { %1998 = vmatprep.subr.bf16.mxu0 %v1997_v10 }
  0x3c   : > { %2000 = vmatpush3.bf16.msra.mxu0 %v1997_v10 }
  0x3d   : > { %2002 = vmatprep.subr.bf16.mxu0 %v2001_v15 }
  0x40   : > { %2004 = vmatpush3.bf16.msra.mxu0 %v2001_v15 }
  0x41   : > { %2006 = vmatprep.subr.bf16.mxu0 %v2005_v18 }
  0x44   : > { %2008 = vmatpush3.bf16.msra.mxu0 %v2005_v18 }
  0x45   : > { %2010 = vmatprep.subr.bf16.mxu0 %v2009_v21 }
  0x48   : > { %2012 = vmatpush3.bf16.msra.mxu0 %v2009_v21 }
  0x49   : > { %2014 = vmatprep.subr.bf16.mxu0 %v2013_v24 }
  0x4c   : > { %2016 = vmatpush3.bf16.msra.mxu0 %v2013_v24 }
  0x4d   : > { %2018 = vmatprep.subr.bf16.mxu0 %v2017_v27 }
  0x50   : > { %2020 = vmatpush3.bf16.msra.mxu0 %v2017_v27 }
  0x51   : > { %2049 = vmatprep.subr.bf16.mxu0 %v2228_v6 }
  0x53   : > { %1840 = vmatmul.mubr.f32.vlgmr.msra.gmra.mrb[2].mxu0 %v617_v28 }
  0x54   : > { %1930 = vmatprep.mubr.msk.f32.mxu0 %vm2229_vm0, %v2230_v11 }
 0x104   : > { %v1806_v54 = vpop.f32.mrb[0].mxu1 }
 0x105   : > { %v613_v55 = vadd.f32 %v1806_v54, %v1618_v53  ;;  %v607_v56 = vpop.f32.mrb[1].mxu1 }
 0x106   : > { %v512_v57 = vpop.f32.mrb[0].mxu0  ;;  %v608_v58 = vadd.f32 %v1618_v53, %v607_v56 }
 0x107   : > { %v1771_v59 = vpop.f32.mrb[1].mxu0  ;;  %v2488_v0 = vadd.f32 %v1617_v61, %v512_v57 }
 0x108   : > { %v2022_v62 = vpack.c.bf16 %v613_v55, %v608_v58  ;;  %v2482_v63 = vpack.i.bf16 %v613_v55, %v608_v58 }
 0x10a   : > { %2119 = vrot.lane.b32.xlu1 %v2482_v63, %s2740_s25  ;;  %2024 = vmatpush3.bf16.xpose.msk.msra.mxu1 %vm2475_vm2, %v2022_v62 }
 0x10b   : > { %2025 = vmatprep.subr.bf16.mxu1 %v2228_v6 }
 0x10e   : > { %881 = vrot.lane.b32.xlu1 %v2488_v0, %s2740_s25 }
 0x111   : > { %1847 = vmatmul.mubr.msk.f32.vlgmr.msra.gmra.mrb[2].mxu1 %vm716_vm1, %v2488_v0 }
 0x112   : > { %1853 = vmatprep.mubr.msk.f32.mxu1 %vm2229_vm0, %v2230_v11 }
 0x126   : > { %v1841_v32 = vpop.f32.mrb[2].mxu0 }
 0x127   : > { %v707_v33 = vpop.f32.mrb[3].mxu0  ;;  %v713_v40 = vadd.f32 %v1841_v32, %v1619_v39 }
 0x128   : > { %v708_v41 = vadd.f32 %v1619_v39, %v707_v33 }
 0x12a   : > { %v2026_v42 = vpack.c.bf16 %v713_v40, %v708_v41  ;;  %v2562_v43 = vpack.i.bf16 %v713_v40, %v708_v41 }
 0x12c   : > { %2027 = vmatpush3.bf16.msra.mxu1 %v2026_v42 }
 0x12d   : > { %2028 = vmatprep.subr.bf16.mxu1 %v2228_v6 }
 0x17c   : > { %v2120_v45 = vpop.permute.xlu1 %2119 }
 0x17d   : > { %v2122_v46 = vunpack.i.h.bf16 %v2120_v45  ;;  %v2121_v47 = vunpack.i.l.bf16 %v2120_v45 }
 0x17f   : > { %v2029_v50 = vpack.c.bf16 %v2122_v46, %v2121_v47 }
 0x180   : > { %v882_v51 = vpop.permute.xlu1 %881 }
 0x1e4   : > { %v792_v29 = vpop.f32.mrb[2].mxu1 }
 0x1e5   : > { %v1848_v30 = vpop.f32.mrb[3].mxu1  ;;  %v797_v31 = vsel %vm796_vm3, %v792_v29, -inf }
 0x1e6   : > { %798 = vmax.xlane.f32.xlu0 %v797_v31 }
 0x273   : > { %v799_v34 = vpop.xlane.xlu0 %798 }
 0x274   : > { %v800_v35 = vsub.f32 %v792_v29, %v799_v34 }
 0x276   : > { %v801_v36 = vmul.f32 1.442695, %v800_v35 }
 0x278   : > { %2148 = vpow2.f32 %v801_v36 }
 0x282   : > { %v2149_v37 = vpop.eup %2148 }
 0x283   : > { %v803_v38 = vsel %vm796_vm3, %v2149_v37, 0.0 }
 0x284   : > { %804 = vadd.xlane.f32.xlu0 %v803_v38 }
 0x311   : > { %v805_v44 = vpop.xlane.xlu0 %804 }
 0x312   : > { %2150 = vrcp.f32 %v805_v44 }
 0x31c   : > { %v2151_v48 = vpop.eup %2150 }
 0x31d   : > { %v807_v49 = vmul.f32 %v2151_v48, %v2149_v37 }
 0x31f   : > { %1854 = vmatmul.mubr.msk.f32.vlgmr.msra.gmra.mrb[4].mxu1 %vm796_vm3, %v807_v49 }
 0x320   : > { %2031 = vmatpush3.bf16.xpose.msk.msra.mxu1 %vm2475_vm2, %v2029_v50  ;;  %1860 = vmatprep.mubr.msk.f32.mxu1 %vm2229_vm0, %v2230_v11  ;;  %v1416_v50 = vld [vmem:[%s2736_s9] sm:$0xff] }
 0x321   : > { %2032 = vmatprep.subr.bf16.mxu1 %v2228_v6 }
 0x327   : > { %1861 = vmatmul.mubr.msk.f32.vlgmr.msra.gmra.mrb[6].mxu1 %vm716_vm1, %v882_v51  ;;  %v1417_v51 = vld [vmem:[%s2736_s9 + $0x8] sm:$0xff] }
 0x328   : > { %1867 = vmatprep.mubr.msk.f32.mxu1 %vm2229_vm0, %v2230_v11 }
 0x3f2   : > { %v2574_v52 = vpop.f32.mrb[4].mxu1 }
 0x3f3   : > { %v1855_v53 = vpop.f32.mrb[5].mxu1 }
 0x3f4   : > { %v1418_v53 = vld [vmem:[%s2736_s9 + $0x10] sm:$0xff] }
 0x3fa   : > { %v959_v54 = vpop.f32.mrb[6].mxu1 }
 0x3fb   : > { %v1862_v55 = vpop.f32.mrb[7].mxu1  ;;  %v963_v56 = vsel %vm796_vm3, %v959_v54, -inf }
 0x3fc   : > { %964 = vmax.xlane.f32.xlu0 %v963_v56  ;;  %v1419_v55 = vld [vmem:[%s2736_s9 + $0x18] sm:$0xff] }
 0x3fd   : > { %v2053_v56 = vpack.c.bf16 %v1419_v55, %v1418_v53 }
 0x412   : > { %2124 = vrot.lane.b32.xlu0 %v2562_v43, %s2748_s15 }
 0x416   : > { %2129 = vrot.lane.b32.xlu0 %v2482_v63, %s2232_s19 }
 0x41a   : > { %1055 = vrot.lane.b32.xlu0 %v2488_v0, %s2232_s19 }
 0x489   : > { %v965_v57 = vpop.xlane.xlu0 %964 }
 0x48a   : > { %v966_v58 = vsub.f32 %v959_v54, %v965_v57  ;;  %v2050_v54 = vpack.c.bf16 %v1417_v51, %v1416_v50  ;;  %v1420_v57 = vld [vmem:[%s2736_s9 + $0x20] sm:$0xff] }
 0x48c   : > { %v967_v59 = vmul.f32 1.442695, %v966_v58  ;;  %2051 = vmatpush3.bf16.msra.mxu0 %v2050_v54  ;;  %v1421_v58 = vld [vmem:[%s2736_s9 + $0x28] sm:$0xff] }
 0x48d   : > { %v2125_v61 = vpop.permute.xlu0 %2124  ;;  %2052 = vmatprep.subr.bf16.mxu0 %v2228_v6 }
 0x48e   : > { %2152 = vpow2.f32 %v967_v59  ;;  %v2127_v62 = vunpack.i.h.bf16 %v2125_v61  ;;  %v2126_v1 = vunpack.i.l.bf16 %v2125_v61  ;;  %v2056_v59 = vpack.c.bf16 %v1421_v58, %v1420_v57  ;;  %v1422_v61 = vld [vmem:[%s2736_s9 + $0x30] sm:$0xff] }
 0x490   : > { %v2033_v2 = vpack.c.bf16 %v2127_v62, %v2126_v1  ;;  %2054 = vmatpush3.bf16.msra.mxu0 %v2053_v56  ;;  %v1423_v62 = vld [vmem:[%s2736_s9 + $0x38] sm:$0xff] }
 0x491   : > { %v2130_v7 = vpop.permute.xlu0 %2129  ;;  %2055 = vmatprep.subr.bf16.mxu0 %v2228_v6  ;;  %v2059_v1 = vpack.c.bf16 %v1423_v62, %v1422_v61 }
 0x492   : > { %2034 = vmatpush3.bf16.msra.mxu1 %v2033_v2  ;;  %v2132_v8 = vunpack.i.h.bf16 %v2130_v7  ;;  %v2131_v9 = vunpack.i.l.bf16 %v2130_v7  ;;  %v1424_v2 = vld [vmem:[%s2736_s9 + $0x40] sm:$0xff]  ;;  %v1427_v7 = vld [vmem:[%s2736_s9 + $0x58] sm:$0xff] }
 0x493   : > { %2035 = vmatprep.subr.bf16.mxu1 %v2228_v6 }
 0x494   : > { %v2036_v13 = vpack.c.bf16 %v2132_v8, %v2131_v9  ;;  %2057 = vmatpush3.bf16.msra.mxu0 %v2056_v59  ;;  %v1428_v9 = vld [vmem:[%s2736_s9 + $0x60] sm:$0xff] }
 0x495   : > { %v1056_v16 = vpop.permute.xlu0 %1055  ;;  %2058 = vmatprep.subr.bf16.mxu0 %v2228_v6 }
 0x498   : > { %v2153_v3 = vpop.eup %2152  ;;  %2060 = vmatpush3.bf16.msra.mxu0 %v2059_v1 }
 0x499   : > { %v969_v4 = vsel %vm796_vm3, %v2153_v3, 0.0  ;;  %2061 = vmatprep.subr.bf16.mxu0 %v2228_v6 }
 0x49a   : > { %970 = vadd.xlane.f32.xlu1 %v969_v4 }
 0x4ab   : > { %2134 = vrot.lane.b32.xlu1 %v2562_v43, %s2232_s19 }
 0x4af   : > { %2139 = vrot.lane.b32.xlu1 %v2482_v63, %s2233_s26 }
 0x527   : > { %v971_v5 = vpop.xlane.xlu1 %970 }
 0x528   : > { %2154 = vrcp.f32 %v971_v5  ;;  %v1426_v5 = vld [vmem:[%s2736_s9 + $0x50] sm:$0xff] }
 0x529   : > { %v2065_v8 = vpack.c.bf16 %v1427_v7, %v1426_v5 }
 0x52b   : > { %v2135_v14 = vpop.permute.xlu1 %2134 }
 0x52c   : > { %v2137_v63 = vunpack.i.h.bf16 %v2135_v14  ;;  %v2136_v15 = vunpack.i.l.bf16 %v2135_v14  ;;  %v1431_v14 = vld [vmem:[%s2736_s9 + $0x78] sm:$0xff] }
 0x52e   : > { %v2040_v17 = vpack.c.bf16 %v2137_v63, %v2136_v15 }
 0x52f   : > { %v2140_v28 = vpop.permute.xlu1 %2139 }
 0x530   : > { %v2142_v30 = vunpack.i.h.bf16 %v2140_v28  ;;  %v2141_v31 = vunpack.i.l.bf16 %v2140_v28 }
 0x532   : > { %v2155_v10 = vpop.eup %2154  ;;  %v2043_v34 = vpack.c.bf16 %v2142_v30, %v2141_v31 }
 0x533   : > { %v973_v12 = vmul.f32 %v2155_v10, %v2153_v3  ;;  %v1425_v3 = vld [vmem:[%s2736_s9 + $0x48] sm:$0xff] }
 0x534   : > { %v2062_v4 = vpack.c.bf16 %v1425_v3, %v1424_v2  ;;  %v1429_v10 = vld [vmem:[%s2736_s9 + $0x68] sm:$0xff] }
 0x535   : > { %1868 = vmatmul.mubr.msk.f32.vlgmr.msra.gmra.mrb[8].mxu1 %vm796_vm3, %v973_v12  ;;  %v2068_v12 = vpack.c.bf16 %v1429_v10, %v1428_v9 }
 0x536   : > { %2038 = vmatpush3.bf16.xpose.msk.msra.mxu1 %vm2475_vm2, %v2036_v13  ;;  %1874 = vmatprep.mubr.msk.f32.mxu1 %vm2229_vm0, %v2230_v11  ;;  %v1430_v13 = vld [vmem:[%s2736_s9 + $0x70] sm:$0xff] }
 0x537   : > { %2039 = vmatprep.subr.bf16.mxu1 %v2228_v6  ;;  %2063 = vmatpush3.bf16.msra.mxu0 %v2062_v4  ;;  %v2071_v63 = vpack.c.bf16 %v1431_v14, %v1430_v13 }
 0x538   : > { %2064 = vmatprep.subr.bf16.mxu0 %v2228_v6 }
 0x53b   : > { %2066 = vmatpush3.bf16.msra.mxu0 %v2065_v8 }
 0x53c   : > { %2067 = vmatprep.subr.bf16.mxu0 %v2228_v6 }
 0x53d   : > { %1875 = vmatmul.mubr.msk.f32.vlgmr.msra.gmra.mrb[10].mxu1 %vm716_vm1, %v1056_v16 }
 0x53e   : > { %2041 = vmatpush3.bf16.msra.mxu1 %v2040_v17  ;;  %1881 = vmatprep.mubr.msk.f32.mxu1 %vm2229_vm0, %v2230_v11 }
 0x53f   : > { %2042 = vmatprep.subr.bf16.mxu1 %v2228_v6  ;;  %2069 = vmatpush3.bf16.msra.mxu0 %v2068_v12 }
 0x540   : > { %2070 = vmatprep.subr.bf16.mxu0 %v2228_v6 }
 0x543   : > { %2072 = vmatpush3.bf16.msra.mxu0 %v2071_v63 }
 0x608   : > { %v1051_v18 = vpop.f32.mrb[8].mxu1 }
 0x609   : > { %v1869_v19 = vpop.f32.mrb[9].mxu1 }
 0x610   : > { %v1133_v20 = vpop.f32.mrb[10].mxu1 }
 0x611   : > { %v1876_v21 = vpop.f32.mrb[11].mxu1  ;;  %v1137_v22 = vsel %vm796_vm3, %v1133_v20, -inf }
 0x612   : > { %1138 = vmax.xlane.f32.xlu0 %v1137_v22 }
 0x69f   : > { %v1139_v23 = vpop.xlane.xlu0 %1138 }
 0x6a0   : > { %v1140_v24 = vsub.f32 %v1133_v20, %v1139_v23 }
 0x6a2   : > { %v1141_v25 = vmul.f32 1.442695, %v1140_v24 }
 0x6a4   : > { %2156 = vpow2.f32 %v1141_v25 }
 0x6ae   : > { %v2157_v26 = vpop.eup %2156 }
 0x6af   : > { %v1143_v27 = vsel %vm796_vm3, %v2157_v26, 0.0 }
 0x6b0   : > { %1144 = vadd.xlane.f32.xlu1 %v1143_v27 }
 0x6c1   : > { %1227 = vrot.lane.b32.xlu1 %v2488_v0, %s2233_s26 }
 0x73d   : > { %v1145_v29 = vpop.xlane.xlu1 %1144 }
 0x73e   : > { %2158 = vrcp.f32 %v1145_v29 }
 0x741   : > { %v1228_v35 = vpop.permute.xlu1 %1227 }
 0x748   : > { %v2159_v32 = vpop.eup %2158 }
 0x749   : > { %v1147_v33 = vmul.f32 %v2159_v32, %v2157_v26 }
 0x74b   : > { %1882 = vmatmul.mubr.msk.f32.vlgmr.msra.gmra.mrb[12].mxu1 %vm796_vm3, %v1147_v33 }
 0x74c   : > { %2045 = vmatpush3.bf16.xpose.msk.msra.mxu1 %vm2475_vm2, %v2043_v34  ;;  %1888 = vmatprep.mubr.msk.f32.mxu1 %vm2229_vm0, %v2230_v11 }
 0x74d   : > { %2046 = vmatprep.subr.bf16.mxu1 %v2228_v6  ;;  %v1636_v6 = vld [vmem:[%s2737_s10] ss:$0 sm:$0xff] }
 0x753   : > { %1889 = vmatmul.mubr.msk.f32.vlgmr.msra.gmra.mrb[14].mxu1 %vm716_vm1, %v1228_v35 }
 0x754   : > { %1895 = vmatprep.mubr.msk.f32.mxu1 %vm2229_vm0, %v2230_v11 }
 0x81e   : > { %v1223_v0 = vpop.f32.mrb[12].mxu1 }
 0x81f   : > { %v1883_v36 = vpop.f32.mrb[13].mxu1 }
 0x826   : > { %v1305_v37 = vpop.f32.mrb[14].mxu1 }
 0x827   : > { %v1890_v38 = vpop.f32.mrb[15].mxu1  ;;  %v1309_v39 = vsel %vm796_vm3, %v1305_v37, -inf }
 0x828   : > { %1310 = vmax.xlane.f32.xlu0 %v1309_v39 }
 0x83e   : > { %2144 = vrot.lane.b32.xlu0 %v2562_v43, %s2233_s26 }
 0x842   : > { %1400 = vrot.lane.b32.xlu0 %v1051_v18, %s2233_s26  ;;  %s405_s26 = sand.u32 1, %s2218_s18  }
 0x843   : > { %s1611_s25 = sshll.u32 %s405_s26, 3  ;;  %s1511_s14 = scalar_lea.sflag [#allocation3], %s405_s26 }
 0x844   : > { %s407_s30 = scalar_lea.vmem [#allocation2], %s1611_s25 }
 0x845   : > { %s1524_s24 = sshll.u32 %s407_s30, 4  ;;  %s2687_s24 = int_to_ptr.vmem [resolvable:$true] %s1524_s24 }
 0x846   : > { %1404 = vrot.lane.b32.xlu0 %v1223_v0, %s2232_s19  ;;  %s2164_s19 = scalar_lea.vmem %s2687_s24, 128 }
 0x847   : > { %p2165_p11 = scmp.ne.s32.totalorder %s2687_s24, %s2164_s19 }
 0x849   : > { %p2166_p12 = pnand %p2165_p11, %p2333_p5 }
 0x84b   : > { %p2167_p13 = pneg %p2166_p12 }
 0x8b5   : > { %v1311_v60 = vpop.xlane.xlu0 %1310 }
 0x8b6   : > { %v1312_v40 = vsub.f32 %v1305_v37, %v1311_v60 }
 0x8b8   : > { %v1313_v41 = vmul.f32 1.442695, %v1312_v40 }
 0x8b9   : > { %v2145_v42 = vpop.permute.xlu0 %2144 }
 0x8ba   : > { %2160 = vpow2.f32 %v1313_v41  ;;  %v2147_v11 = vunpack.i.h.bf16 %v2145_v42  ;;  %v2146_v44 = vunpack.i.l.bf16 %v2145_v42 }
 0x8bc   : > { %v2047_v45 = vpack.c.bf16 %v2147_v11, %v2146_v44 }
 0x8bd   : > { %v1401_v17 = vpop.permute.xlu0 %1400 }
 0x8be   : > { %2048 = vmatpush3.bf16.msra.mxu1 %v2047_v45  ;;  %v1411_v19 = vsel %vm716_vm1, %v2574_v52, %v1401_v17 }
 0x8c1   : > { %v1405_v18 = vpop.permute.xlu0 %1404 }
 0x8c2   : > { %v1413_v20 = vsel %vm1412_vm4, %v1411_v19, %v1405_v18 }
 0x8c4   : > { %v2161_v46 = vpop.eup %2160 }
 0x8c5   : > { %v1315_v47 = vsel %vm796_vm3, %v2161_v46, 0.0 }
 0x8c6   : > { %1316 = vadd.xlane.f32.xlu1 %v1315_v47 }
 0x953   : > { %v1317_v48 = vpop.xlane.xlu1 %1316 }
 0x954   : > { %2162 = vrcp.f32 %v1317_v48 }
 0x95e   : > { %v2163_v43 = vpop.eup %2162 }
 0x95f   : > { %v1319_v49 = vmul.f32 %v2163_v43, %v2161_v46 }
 0x961   : > { %1896 = vmatmul.mubr.msk.f32.vlgmr.msra.gmra.mrb[16].mxu1 %vm796_vm3, %v1319_v49 }
 0xa34   : > { %v1395_v15 = vpop.f32.mrb[16].mxu1 }
 0xa35   : > { %1408 = vrot.lane.b32.xlu0 %v1395_v15, %s2748_s15  ;;  %v1897_v16 = vpop.f32.mrb[17].mxu1  ;;  %s1638_s15 = sshll.u32 %s2316_s21, 7  ;;  %s2234_s21 = smov [#allocation2]  }
 0xa36   : > { %s2685_s22 = scalar_lea.hbm %s2738_s11, %s1638_s15  ;;  %s2168_s25 = sshll.u32 %s2234_s21, 4  ;;  %s2169_s25 = int_to_ptr.vmem [resolvable:$false] %s2168_s25 }
 0xa37   : > { %s2170_s12 = scalar_lea.vmem %s2169_s25, 256  ;;  %p2171_p0 = scmp.lt.s32.totalorder %s2687_s24, %s2169_s25 }
 0xa38   : > { %p2172_p1 = scmp.lt.s32.totalorder %s2170_s12, %s2164_s19 }
 0xa3a   : > { %p2173_p2 = por %p2172_p1, %p2171_p0 }
 0xa3c   : > { %p2174_p3 = pnand %p2173_p2, %p2167_p13 }
 0xaa7   : > { %v1409_v21 = vpop.permute.xlu0 %1408 }
 0xaa8   : > { %v1415_v22 = vsel %vm1414_vm5, %v1413_v20, %v1409_v21 }
 0xaa9   : > { %1931 = vmatmul.mubr.f32.vlgmr.msra.gmra.mrb[4].mxu0 %v1415_v22 }
 0xb7c   : > { %v1505_v23 = vpop.f32.mrb[4].mxu0 }
 0xb7d   : > { %v1506_v24 = vadd.f32 %v1636_v6, %v1505_v23  ;;  %v1932_v25 = vpop.f32.mrb[5].mxu0 }
 0xb7f   : > { %1509 = vst [vmem:[%s407_s30] sm:$0xff] %v1506_v24 }
 0xb80   : > { %2177 = shalt.err (!%p2174_p3)
}
 0xb81   : > { %s2178_s26 = scalar_lea.hbm %s2685_s22, 128  ;;  %s2182_s30 = scalar_lea.hbm %s2738_s11, 256 }
 0xb82   : > { %p2179_p4 = scmp.ne.s32.totalorder %s2685_s22, %s2178_s26  ;;  %p2183_p9 = scmp.lt.u32.totalorder %s2685_s22, %s2738_s11 }
 0xb83   : > { %p2184_p10 = scmp.lt.u32.totalorder %s2182_s30, %s2178_s26  ;;  %p2186_p12 = scmp.lt.u32.totalorder %s2178_s26, %s2685_s22 }
 0xb84   : > { %p2180_p7 = pnand %p2179_p4, %p2333_p5 }
 0xb85   : > { %p2185_p11 = por %p2184_p10, %p2183_p9 }
 0xb86   : > { %p2181_p8 = pneg %p2180_p7 }
 0xb87   : > { %p2187_p13 = por %p2186_p12, %p2185_p11 }
 0xb89   : > { %p2188_p0 = pnand %p2187_p13, %p2181_p8 }
 0xb8b   : > { %2191 = shalt.err (!%p2188_p0)
}
 0xb8c   : > { %2073 = dma.vmem_to_hbm [thread:$0]  (%p2333_p5), %s2687_s24, 128, %s2685_s22, %s1511_s14  }
 0xb8d PF: > { %p2079_p1 = scmp.ge.s32.totalorder %s2226_s20, 2  ;;  %s1536_s19 = sand.u32 1, %s2214_s17  }
 0xb8e   : > { %s1537_s21 = scalar_lea.sflag [#allocation3], %s1536_s19 }
 0xb8f   : > { %p2076_p2 = pnand %p2079_p1, %p2337_p6 }
 0xb91   : > { %2209 = dma.done.wait (!%p2076_p2), %s1537_s21, 128  }
 0xb92   : > { %2211 = vsyncadd (!%p2076_p2), %s1537_s21, 4294967168  ;;  %s2749_s25 = sld [smem:[#allocation5_spill]]  ;;  %s2750_s19 = sld [smem:[#allocation6_spill]] }
 0xb93   : > { %p21_p3 = scmp.ge.s32.totalorder %s2320_s23, 4   ;;  %s2751_s17 = smov %s2218_s18 }
 0xb94   : > { %s2753_s20 = smov %s2320_s23 }
 0xb95   :  { %23 = sbr.rel (!%p21_p3) target bundleno = 3 (0x3), region = 105 }
 0xb98   : > { %s2752_s18 = smov %s2749_s25 }
 0xb9c   :  { %1542 = vsyncpa [#allocation3], 1 }
 0xb9d   :  { %1544 = vsyncpa [#allocation3 + $0x1], 1 }

</bundles_post_ra>
